<compile_context>
chip_gen: v6e
topology: v6e:2x2x1
jax: 0.10.0
libtpu: 0.0.40
codegen_flags: <defaults>
</compile_context>

<pallas_src>
import functools

import jax
import jax.numpy as jnp
from jax.experimental import pallas as pl
from jax.experimental.pallas import tpu as pltpu


NEG_INF = -1e30  # finite "minus infinity" so the online-lse math never produces NaN


def _round_up(x, m):
    return ((x + m - 1) // m) * m


def _proj_logsoftmax_kernel(x_ref, w_ref, b_ref, o_ref, m_ref, l_ref):
    # x_ref: (tm, d_model) bf16       w_ref: (d_model, tn) bf16      b_ref: (1, tn) f32
    # o_ref: (tm, nj, tn) out dtype   m_ref/l_ref: (tm, 1) f32 scratch (online lse state)
    j = pl.program_id(1)
    nj = pl.num_programs(1)

    @pl.when(j == 0)
    def _init():
        m_ref[...] = jnp.full(m_ref.shape, NEG_INF, dtype=m_ref.dtype)
        l_ref[...] = jnp.zeros(l_ref.shape, dtype=l_ref.dtype)

    # bf16 x bf16 matmul on the MXU with f32 accumulation; bias add in f32.
    logits = jnp.dot(x_ref[...], w_ref[...],
                     preferred_element_type=jnp.float32) + b_ref[...]

    # Online log-sum-exp update across vocab tiles.
    m_prev = m_ref[...]
    m_new = jnp.maximum(m_prev, jnp.max(logits, axis=-1, keepdims=True))
    l_ref[...] = (l_ref[...] * jnp.exp(m_prev - m_new)
                  + jnp.sum(jnp.exp(logits - m_new), axis=-1, keepdims=True))
    m_ref[...] = m_new

    # Stash raw logits for this vocab tile in the resident full-vocab output block.
    o_ref[:, pl.ds(j, 1), :] = logits[:, None, :].astype(o_ref.dtype)

    # Finalize: subtract lse once, then the whole block is written back to HBM once.
    @pl.when(j == nj - 1)
    def _finalize():
        lse = m_ref[...] + jnp.log(l_ref[...])            # (tm, 1)
        o_ref[...] = (o_ref[...].astype(jnp.float32)
                      - lse[:, :, None]).astype(o_ref.dtype)


@functools.partial(jax.jit, static_argnames=("tm", "tn", "out_dtype"))
def projection_layer(x, weight, bias, *, tm=256, tn=512, out_dtype=None):
    """log_softmax(x @ weight.T + bias, axis=-1).

    x: (batch, seq, d_model); weight: (vocab, d_model); bias: (vocab,).
    Returns (batch, seq, vocab) in `out_dtype` (defaults to x.dtype).
    """
    batch, seq, d_model = x.shape
    vocab = weight.shape[0]
    out_dtype = out_dtype or x.dtype

    rows = batch * seq
    # bf16 operands for the MXU; accumulation stays f32 via preferred_element_type.
    x2 = x.reshape(rows, d_model).astype(jnp.bfloat16)
    w_t = weight.T.astype(jnp.bfloat16)                  # (d_model, vocab)
    b2 = bias.astype(jnp.float32).reshape(1, vocab)

    # Row tiling: pad instead of asserting divisibility; clamp for tiny inputs.
    tm_eff = min(tm, _round_up(rows, 8))
    rows_pad = _round_up(rows, tm_eff)

    # Vocab tiling: tn must be a multiple of 128 lanes.
    tn_eff = min(tn, _round_up(vocab, 128))
    tn_eff = _round_up(tn_eff, 128)
    v_pad = _round_up(vocab, tn_eff)
    nj = v_pad // tn_eff

    if rows_pad != rows:
        x2 = jnp.pad(x2, ((0, rows_pad - rows), (0, 0)))
    if v_pad != vocab:
        w_t = jnp.pad(w_t, ((0, 0), (0, v_pad - vocab)))
        # Padded vocab columns get a huge-negative bias so they never affect max / sum(exp).
        b2 = jnp.pad(b2, ((0, 0), (0, v_pad - vocab)), constant_values=NEG_INF)

    grid = (rows_pad // tm_eff, nj)

    out3 = pl.pallas_call(
        _proj_logsoftmax_kernel,
        out_shape=jax.ShapeDtypeStruct((rows_pad, nj, tn_eff), out_dtype),
        grid_spec=pltpu.PrefetchScalarGridSpec(
            num_scalar_prefetch=0,
            grid=grid,
            in_specs=[
                pl.BlockSpec((tm_eff, d_model), lambda i, j: (i, 0)),   # x row tile (resident over j)
                pl.BlockSpec((d_model, tn_eff), lambda i, j: (0, j)),   # streamed weight tile
                pl.BlockSpec((1, tn_eff), lambda i, j: (0, j)),         # streamed bias tile
            ],
            out_specs=pl.BlockSpec((tm_eff, nj, tn_eff), lambda i, j: (i, 0, 0)),
            scratch_shapes=[
                pltpu.VMEM((tm_eff, 1), jnp.float32),   # running max
                pltpu.VMEM((tm_eff, 1), jnp.float32),   # running sum(exp)
            ],
        ),
        compiler_params=pltpu.CompilerParams(
            dimension_semantics=("parallel", "arbitrary"),
            vmem_limit_bytes=48 * 1024 * 1024,
        ),
    )(x2, w_t, b2)

    out2 = out3.reshape(rows_pad, v_pad)[:rows, :vocab]
    return out2.reshape(batch, seq, vocab).astype(out_dtype)


if __name__ == "__main__":
    # Small shapes consistent with the module: (batch, seq, d_model) -> (batch, seq, vocab)
    batch, seq, d_model, vocab = 2, 8, 32, 128

    key = jax.random.PRNGKey(0)
    kx, kw, kb = jax.random.split(key, 3)

    x = jax.random.normal(kx, (batch, seq, d_model), dtype=jnp.float32)
    # Deterministic init mimicking nn.Linear's uniform(-1/sqrt(d_model), 1/sqrt(d_model))
    bound = 1.0 / (d_model ** 0.5)
    weight = jax.random.uniform(kw, (vocab, d_model), dtype=jnp.float32,
                                minval=-bound, maxval=bound)
    bias = jax.random.uniform(kb, (vocab,), dtype=jnp.float32,
                              minval=-bound, maxval=bound)

    out = projection_layer(x, weight, bias)
    out = jax.block_until_ready(out)
    assert out.shape == (batch, seq, vocab)

    # Reference with the same bf16 operand rounding (accumulation in f32), matching the kernel.
    x_bf = x.astype(jnp.bfloat16).astype(jnp.float32)
    w_bf = weight.astype(jnp.bfloat16).astype(jnp.float32)
    ref = jax.nn.log_softmax(x_bf @ w_bf.T + bias, axis=-1)
    assert jnp.allclose(out, ref, atol=1e-4, rtol=1e-4), float(jnp.max(jnp.abs(out - ref)))

    print("KERNEL_OK")
</pallas_src>

<mosaic_0001>
module attributes {stable_mosaic.version = 11 : i64} {
  func.func @_proj_logsoftmax_kernel(%arg0: i32, %arg1: i32, %arg2: memref<16x32xbf16, #tpu.memory_space<vmem>>, %arg3: memref<32x128xbf16, #tpu.memory_space<vmem>>, %arg4: memref<1x128xf32, #tpu.memory_space<vmem>>, %arg5: memref<16x1x128xf32, #tpu.memory_space<vmem>>, %arg6: memref<16x1xf32, #tpu.memory_space<vmem>>, %arg7: memref<16x1xf32, #tpu.memory_space<vmem>>) attributes {dimension_semantics = [#tpu.dimension_semantics<parallel>, #tpu.dimension_semantics<arbitrary>], iteration_bounds = array<i64: 1, 1>, scalar_prefetch = 0 : i64, scratch_operands = 2 : i64, tpu.core_type = #tpu.core_type<tc>, window_params = [{transform_indices = @transform_0, window_bounds = array<i64: 16, 32>}, {transform_indices = @transform_1, window_bounds = array<i64: 32, 128>}, {transform_indices = @transform_2, window_bounds = array<i64: 1, 128>}, {transform_indices = @transform_3, window_bounds = array<i64: 16, 1, 128>}]} {
    %c0_i32 = arith.constant 0 : i32
    %0 = arith.cmpi eq, %arg1, %c0_i32 : i32
    %1 = arith.extui %0 : i1 to i32
    %c0_i32_0 = arith.constant 0 : i32
    %2 = arith.cmpi ne, %1, %c0_i32_0 : i32
    scf.if %2 {
      %cst_20 = arith.constant -1.000000e+30 : f32
      %31 = vector.broadcast %cst_20 : f32 to vector<16x1xf32>
      %c0_21 = arith.constant 0 : index
      %c0_22 = arith.constant 0 : index
      %32 = vector.load %arg6[%c0_21, %c0_22] : memref<16x1xf32, #tpu.memory_space<vmem>>, vector<16x1xf32>
      tpu.vector_store %arg6[%c0_21, %c0_22], %31 {strides = array<i32>} : memref<16x1xf32, #tpu.memory_space<vmem>>, vector<16x1xf32>,
      %cst_23 = arith.constant 0.000000e+00 : f32
      %33 = vector.broadcast %cst_23 : f32 to vector<16x1xf32>
      %c0_24 = arith.constant 0 : index
      %c0_25 = arith.constant 0 : index
      %34 = vector.load %arg7[%c0_24, %c0_25] : memref<16x1xf32, #tpu.memory_space<vmem>>, vector<16x1xf32>
      tpu.vector_store %arg7[%c0_24, %c0_25], %33 {strides = array<i32>} : memref<16x1xf32, #tpu.memory_space<vmem>>, vector<16x1xf32>,
    } else {
    }
    %c0 = arith.constant 0 : index
    %c0_1 = arith.constant 0 : index
    %3 = vector.load %arg2[%c0, %c0_1] : memref<16x32xbf16, #tpu.memory_space<vmem>>, vector<16x32xbf16>
    %c0_2 = arith.constant 0 : index
    %c0_3 = arith.constant 0 : index
    %4 = vector.load %arg3[%c0_2, %c0_3] : memref<32x128xbf16, #tpu.memory_space<vmem>>, vector<32x128xbf16>
    %cst = arith.constant dense<0.000000e+00> : vector<16x128xf32>
    %5 = tpu.matmul %3, %4, %cst {dimension_numbers = #tpu.dot_dimension_numbers<[1], [0], [0], [1], [0, 0, 1, 1], [], []>} : vector<16x32xbf16>, vector<32x128xbf16>, vector<16x128xf32> -> vector<16x128xf32>
    %c0_4 = arith.constant 0 : index
    %c0_5 = arith.constant 0 : index
    %6 = vector.load %arg4[%c0_4, %c0_5] : memref<1x128xf32, #tpu.memory_space<vmem>>, vector<1x128xf32>
    %7 = vector.broadcast %6 : vector<1x128xf32> to vector<16x128xf32>
    %8 = arith.addf %5, %7 : vector<16x128xf32>
    %c0_6 = arith.constant 0 : index
    %c0_7 = arith.constant 0 : index
    %9 = vector.load %arg6[%c0_6, %c0_7] : memref<16x1xf32, #tpu.memory_space<vmem>>, vector<16x1xf32>
    %cst_8 = arith.constant dense<0xFF800000> : vector<16xf32>
    %10 = vector.multi_reduction <maximumf>, %8, %cst_8 [1] : vector<16x128xf32> to vector<16xf32>
    %11 = vector.shape_cast %10 : vector<16xf32> to vector<16x1xf32>
    %12 = arith.maximumf %9, %11 : vector<16x1xf32>
    %c0_9 = arith.constant 0 : index
    %c0_10 = arith.constant 0 : index
    %13 = vector.load %arg7[%c0_9, %c0_10] : memref<16x1xf32, #tpu.memory_space<vmem>>, vector<16x1xf32>
    %14 = arith.subf %9, %12 : vector<16x1xf32>
    %15 = math.exp %14 : vector<16x1xf32>
    %16 = arith.mulf %13, %15 : vector<16x1xf32>
    %17 = vector.broadcast %12 : vector<16x1xf32> to vector<16x128xf32>
    %18 = arith.subf %8, %17 : vector<16x128xf32>
    %19 = math.exp %18 : vector<16x128xf32>
    %cst_11 = arith.constant dense<0.000000e+00> : vector<16xf32>
    %20 = vector.multi_reduction <add>, %19, %cst_11 [1] : vector<16x128xf32> to vector<16xf32>
    %21 = vector.shape_cast %20 : vector<16xf32> to vector<16x1xf32>
    %22 = arith.addf %16, %21 : vector<16x1xf32>
    %c0_12 = arith.constant 0 : index
    %c0_13 = arith.constant 0 : index
    %23 = vector.load %arg7[%c0_12, %c0_13] : memref<16x1xf32, #tpu.memory_space<vmem>>, vector<16x1xf32>
    tpu.vector_store %arg7[%c0_12, %c0_13], %22 {strides = array<i32>} : memref<16x1xf32, #tpu.memory_space<vmem>>, vector<16x1xf32>,
    %c0_14 = arith.constant 0 : index
    %c0_15 = arith.constant 0 : index
    %24 = vector.load %arg6[%c0_14, %c0_15] : memref<16x1xf32, #tpu.memory_space<vmem>>, vector<16x1xf32>
    tpu.vector_store %arg6[%c0_14, %c0_15], %12 {strides = array<i32>} : memref<16x1xf32, #tpu.memory_space<vmem>>, vector<16x1xf32>,
    %25 = vector.shape_cast %8 : vector<16x128xf32> to vector<16x1x128xf32>
    %c0_16 = arith.constant 0 : index
    %26 = arith.index_cast %arg1 : i32 to index
    %c0_17 = arith.constant 0 : index
    %27 = vector.load %arg5[%c0_16, %26, %c0_17] : memref<16x1x128xf32, #tpu.memory_space<vmem>>, vector<16x1x128xf32>
    tpu.vector_store %arg5[%c0_16, %26, %c0_17], %25 {strides = array<i32>} : memref<16x1x128xf32, #tpu.memory_space<vmem>>, vector<16x1x128xf32>,
    %c0_i32_18 = arith.constant 0 : i32
    %28 = arith.cmpi eq, %arg1, %c0_i32_18 : i32
    %29 = arith.extui %28 : i1 to i32
    %c0_i32_19 = arith.constant 0 : i32
    %30 = arith.cmpi ne, %29, %c0_i32_19 : i32
    scf.if %30 {
      %c0_20 = arith.constant 0 : index
      %c0_21 = arith.constant 0 : index
      %31 = vector.load %arg6[%c0_20, %c0_21] : memref<16x1xf32, #tpu.memory_space<vmem>>, vector<16x1xf32>
      %c0_22 = arith.constant 0 : index
      %c0_23 = arith.constant 0 : index
      %32 = vector.load %arg7[%c0_22, %c0_23] : memref<16x1xf32, #tpu.memory_space<vmem>>, vector<16x1xf32>
      %33 = math.log %32 : vector<16x1xf32>
      %34 = arith.addf %31, %33 : vector<16x1xf32>
      %c0_24 = arith.constant 0 : index
      %c0_25 = arith.constant 0 : index
      %c0_26 = arith.constant 0 : index
      %35 = vector.load %arg5[%c0_24, %c0_25, %c0_26] : memref<16x1x128xf32, #tpu.memory_space<vmem>>, vector<16x1x128xf32>
      %36 = vector.shape_cast %34 : vector<16x1xf32> to vector<16x1x1xf32>
      %37 = vector.broadcast %36 : vector<16x1x1xf32> to vector<16x1x128xf32>
      %38 = arith.subf %35, %37 : vector<16x1x128xf32>
      %c0_27 = arith.constant 0 : index
      %c0_28 = arith.constant 0 : index
      %c0_29 = arith.constant 0 : index
      %39 = vector.load %arg5[%c0_27, %c0_28, %c0_29] : memref<16x1x128xf32, #tpu.memory_space<vmem>>, vector<16x1x128xf32>
      tpu.vector_store %arg5[%c0_27, %c0_28, %c0_29], %38 {strides = array<i32>} : memref<16x1x128xf32, #tpu.memory_space<vmem>>, vector<16x1x128xf32>,
    } else {
    }
    return
  }
  func.func @transform_0(%arg0: i32, %arg1: i32) -> (i32, i32) {
    %c0_i32 = arith.constant 0 : i32
    %c0_i32_0 = arith.constant 0 : i32
    return %arg0, %c0_i32 : i32, i32
  }
  func.func @transform_1(%arg0: i32, %arg1: i32) -> (i32, i32) {
    %c0_i32 = arith.constant 0 : i32
    %c0_i32_0 = arith.constant 0 : i32
    return %c0_i32, %arg1 : i32, i32
  }
  func.func @transform_2(%arg0: i32, %arg1: i32) -> (i32, i32) {
    %c0_i32 = arith.constant 0 : i32
    %c0_i32_0 = arith.constant 0 : i32
    return %c0_i32, %arg1 : i32, i32
  }
  func.func @transform_3(%arg0: i32, %arg1: i32) -> (i32, i32, i32) {
    %c0_i32 = arith.constant 0 : i32
    %c0_i32_0 = arith.constant 0 : i32
    %c0_i32_1 = arith.constant 0 : i32
    return %arg0, %c0_i32, %c0_i32_0 : i32, i32, i32
  }
}

</mosaic_0001>

<bundles_post_ra>
// kernel: projection_layer.1
= control target key start
LH: loop header
LB: loop body
LE: loop exit
PB: predicated region body
PF: predicated region fallthrough
CT: control target
= control target key end

     0   :  { %v653_v1 = vmov 0.0   ;;  %vm654_vm0 = vmmov 0   ;;  %s766_s0 = inlined_call_operand.vmem [shape: bf16[16,32], index: 0, kind: input, shape index: {}]   ;;  %s767_s1 = inlined_call_operand.vmem [shape: bf16[32,128], index: 1, kind: input, shape index: {}]   ;;  %s768_s2 = inlined_call_operand.vmem [shape: f32[1,128], index: 2, kind: input, shape index: {}]   ;;  %s769_s3 = inlined_call_operand.hbm [shape: f32[16,1,128], index: 3, kind: output, shape index: {}]  }
   0x1   :  { %v616_v0 = vld [vmem:[%s767_s1 + $0x8] sm:$0xff]   ;;  %598 = vmatprep.subr.bf16.mxu0 %v653_v1  ;;  %v617_v2 = vld [vmem:[%s767_s1] sm:$0xff]   ;;  %602 = vmatprep.mubr.msk.bf16.mxu0 %vm654_vm0, %v653_v1 }
   0x2   :  { %599 = vmatpush3.bf16.msra.mxu0 %v616_v0 }
   0x3   :  { %600 = vmatprep.subr.bf16.mxu0 %v653_v1 }
   0x4   :  { %8 = vsyncpa [#allocation5], 0  ;;  %v618_v3 = vld [vmem:[%s766_s0] sm:$0xff]   ;;  %vm55_vm1 = vcmask 261120   ;;  %v655_v4 = vmov 1966171168   ;;  %v151_v6 = vlaneseq }
   0x5   :  { %v149_v5 = vunpack.c.l.s4 %v655_v4  ;;  %v582_v9 = vld [vmem:[%s768_s2] ss:$0 sm:$0xff]  ;;  %vm20_vm2 = vcmask 7168   ;;  %v656_v19 = vmov -1e+30   ;;  %v657_v43 = vmov 0  }
   0x6   :  { %601 = vmatpush3.bf16.msra.mxu0 %v617_v2  ;;  %v690_v8 = vshrl.u32 %v151_v6, 7  ;;  %21 = vst.msk [vmem:[#allocation2] sm:$0xff] %vm20_vm2, %v656_v19  ;;  %22 = vst.msk [vmem:[#allocation2 + $0x8] sm:$0xff] %vm20_vm2, %v656_v19  ;;  %614 = vset.pattern.permute.xlu1 %v657_v43  ;;  %s658_s0 = smov [#allocation4]  }
   0x7   :  { %v150_v7 = vunpack.c.0.s8 %v149_v5  ;;  %23 = vst.msk [vmem:[#allocation3] sm:$0xff] %vm20_vm2, %v653_v1  ;;  %24 = vst.msk [vmem:[#allocation3 + $0x8] sm:$0xff] %vm20_vm2, %v653_v1  ;;  %615 = vset.pattern.permute.xlu0 %v657_v43  ;;  %s571_s1 = sshll.u32 %s658_s0, 4  ;;  %s572_s1 = int_to_ptr.vmem [resolvable:$true] %s571_s1 }
   0x8   :  { %s631_s2 = scalar_lea.vmem %s572_s1, 256  ;;  %p636_p1 = scmp.lt.s32.totalorder %s572_s1, %s572_s1 }
   0x9   :  { %603 = vmatmul.mubr.msk.bf16.vlgmr.msra.gmra.mxu0 %vm55_vm1, %v618_v3  ;;  %v696_v10 = vsub.s32 %v150_v7, %v690_v8  ;;  %p632_p0 = scmp.ne.s32.totalorder %s572_s1, %s631_s2  ;;  %p637_p2 = scmp.lt.s32.totalorder %s631_s2, %s631_s2 }
   0xb   :  { %p638_p3 = por %p637_p2, %p636_p1 }
   0xd   :  { %v100_v45 = vld [vmem:[#allocation2] sm:$0xff]  ;;  %v101_v48 = vld [vmem:[#allocation2 + $0x8] sm:$0xff]  ;;  %p639_p4 = pnand %p638_p3, %p632_p0 }
   0xe   :  { %v108_v0 = vld [vmem:[#allocation3] sm:$0xff]  ;;  %v109_v4 = vld [vmem:[#allocation3 + $0x8] sm:$0xff] }
  0xc9   :  { %v93_v11 = vpop.f32.mrf.mxu0 }
  0xca   :  { %v698_v12 = vadd.f32 %v582_v9, %v93_v11 }
  0xcb   :  { %v604_v13 = vpop.f32.mrf.mxu0 }
  0xcc   :  { %v147_v14 = vcombine.high %v698_v12, %v698_v12  ;;  %v154_v15 = vrot.slane %v698_v12, %v696_v10  ;;  %102 = vmax.xlane.f32.xlu0 %v698_v12 }
  0xcd   :  { %v96_v16 = vpop.f32.mrf.mxu0 }
  0xce   :  { %v161_v17 = vrot.slane %v147_v14, %v696_v10  ;;  %587 = vst.sshfl [vmem:[#allocation4] sm:$0x1 pattern:$0x73625140] %v154_v15  ;;  %v706_v18 = vadd.f32 %v582_v9, %v96_v16  ;;  %v162_v20 = vcombine.high %v154_v15, %v154_v15  ;;  %v170_v21 = vrot.slane %v154_v15, %v696_v10 }
  0xcf   :  { %v605_v22 = vpop.f32.mrf.mxu0 }
  0xd0   :  { %589 = vst.sshfl [vmem:[#allocation4 + $0x4] sm:$0x1 pattern:$0x73625140] %v161_v17  ;;  %v196_v23 = vcombine.high %v706_v18, %v706_v18  ;;  %v203_v24 = vrot.slane %v706_v18, %v696_v10  ;;  %104 = vmax.xlane.f32.xlu0 %v706_v18  ;;  %v192_v25 = vcombine.high %v170_v21, %v170_v21 }
  0xd1   :  { %588 = vst.sshfl [vmem:[#allocation4 + $0x1] sm:$0x1 pattern:$0x73625140] %v162_v20  ;;  %v184_v26 = vrot.slane %v162_v20, %v696_v10  ;;  %v177_v27 = vrot.slane %v161_v17, %v696_v10  ;;  %v163_v28 = vcombine.high %v161_v17, %v161_v17 }
  0xd2   :  { %v210_v29 = vrot.slane %v196_v23, %v696_v10  ;;  %591 = vst.sshfl [vmem:[#allocation4 + $0x8] sm:$0x1 pattern:$0x73625140] %v203_v24  ;;  %263 = vst [vmem:[#allocation4 + $0x2] sm:$0x1] %v192_v25  ;;  %v219_v31 = vrot.slane %v203_v24, %v696_v10  ;;  %v211_v32 = vcombine.high %v203_v24, %v203_v24 }
  0xd3   :  { %v194_v30 = vcombine.high %v184_v26, %v184_v26  ;;  %v193_v33 = vcombine.high %v177_v27, %v177_v27  ;;  %590 = vst.sshfl [vmem:[#allocation4 + $0x5] sm:$0x1 pattern:$0x73625140] %v163_v28  ;;  %v191_v34 = vrot.slane %v163_v28, %v696_v10 }
  0xd4   :  { %593 = vst.sshfl [vmem:[#allocation4 + $0xc] sm:$0x1 pattern:$0x73625140] %v210_v29  ;;  %v241_v35 = vcombine.high %v219_v31, %v219_v31  ;;  %v233_v36 = vrot.slane %v211_v32, %v696_v10  ;;  %v226_v37 = vrot.slane %v210_v29, %v696_v10  ;;  %v212_v38 = vcombine.high %v210_v29, %v210_v29 }
  0xd5   :  { %264 = vst [vmem:[#allocation4 + $0x3] sm:$0x1] %v194_v30  ;;  %592 = vst.sshfl [vmem:[#allocation4 + $0x9] sm:$0x1 pattern:$0x73625140] %v211_v32  ;;  %v195_v39 = vcombine.high %v191_v34, %v191_v34 }
  0xd6   :  { %267 = vst [vmem:[#allocation4 + $0x6] sm:$0x1] %v193_v33  ;;  %271 = vst [vmem:[#allocation4 + $0xa] sm:$0x1] %v241_v35  ;;  %v243_v40 = vcombine.high %v233_v36, %v233_v36  ;;  %v242_v41 = vcombine.high %v226_v37, %v226_v37  ;;  %v240_v42 = vrot.slane %v212_v38, %v696_v10 }
  0xd7   :  { %594 = vst.sshfl [vmem:[#allocation4 + $0xd] sm:$0x1 pattern:$0x73625140] %v212_v38  ;;  %268 = vst [vmem:[#allocation4 + $0x7] sm:$0x1] %v195_v39 }
  0xd8   :  { %272 = vst [vmem:[#allocation4 + $0xb] sm:$0x1] %v243_v40  ;;  %275 = vst [vmem:[#allocation4 + $0xe] sm:$0x1] %v242_v41  ;;  %v244_v44 = vcombine.high %v240_v42, %v240_v42 }
  0xda   :  { %276 = vst [vmem:[#allocation4 + $0xf] sm:$0x1] %v244_v44 }
 0x155   :  { %v103_v46 = vpop.xlane.xlu0 %102 }
 0x156   :  { %v106_v47 = vmax.f32 %v100_v45, %v103_v46 }
 0x158   :  { %v110_v49 = vsub.f32 %v100_v45, %v106_v47  ;;  %143 = vst.msk [vmem:[#allocation2] sm:$0xff] %vm20_vm2, %v106_v47  ;;  %120 = vperm.xlu1 %614, %v106_v47   ;;  %v745_v47 = vsub.s32 0, %v690_v8 }
 0x159   :  { %v105_v50 = vpop.xlane.xlu0 %104 }
 0x15a   :  { %v107_v51 = vmax.f32 %v101_v48, %v105_v50  ;;  %v112_v61 = vmul.f32 1.442695, %v110_v49  ;;  %v290_v50 = vld [vmem:[#allocation4] sm:$0x1] }
 0x15c   :  { %v111_v52 = vsub.f32 %v101_v48, %v107_v51  ;;  %144 = vst.msk [vmem:[#allocation2 + $0x8] sm:$0xff] %vm20_vm2, %v107_v51  ;;  %125 = vperm.xlu1 %614, %v107_v51  }
 0x15e   :  { %v114_v62 = vmul.f32 1.442695, %v111_v52 }
 0x15f   :  { %v280_v15 = vld [vmem:[#allocation2] sm:$0xff] }
 0x163   :  { %v281_v26 = vld [vmem:[#allocation2 + $0x8] sm:$0xff] }
 0x1d3   :  { %v121_v53 = vpop.permute.xlu1 %120 }
 0x1d4   :  { %v128_v54 = vsub.f32 %v698_v12, %v121_v53 }
 0x1d6   :  { %v130_v55 = vmul.f32 1.442695, %v128_v54  ;;  %v291_v54 = vld [vmem:[#allocation4 + $0x1] sm:$0x1] }
 0x1d7   :  { %v126_v56 = vpop.permute.xlu1 %125 }
 0x1d8   :  { %619 = vpow2.f32 %v130_v55  ;;  %v129_v57 = vsub.f32 %v706_v18, %v126_v56 }
 0x1da   :  { %v132_v58 = vmul.f32 1.442695, %v129_v57  ;;  %v292_v57 = vld [vmem:[#allocation4 + $0x2] sm:$0x1] }
 0x1dc   :  { %621 = vpow2.f32 %v132_v58 }
 0x1dd   :  { %623 = vpow2.f32 %v112_v61 }
 0x1de   :  { %625 = vpow2.f32 %v114_v62 }
 0x1e5   :  { %v620_v59 = vpop.eup %619 }
 0x1e6   :  { %134 = vadd.xlane.f32.xlu0 %v620_v59 }
 0x1e9   :  { %v622_v60 = vpop.eup %621 }
 0x1ea   :  { %136 = vadd.xlane.f32.xlu1 %v622_v60  ;;  %v624_v63 = vpop.eup %623  ;;  %v294_v60 = vld [vmem:[#allocation4 + $0x4] sm:$0x1] }
 0x1eb   :  { %v116_v1 = vmul.f32 %v624_v63, %v108_v0  ;;  %v626_v2 = vpop.eup %625  ;;  %v293_v0 = vld [vmem:[#allocation4 + $0x3] sm:$0x1] }
 0x1ec   :  { %v117_v6 = vmul.f32 %v626_v2, %v109_v4  ;;  %v296_v4 = vld [vmem:[#allocation4 + $0x6] sm:$0x1] }
 0x26f   :  { %v135_v3 = vpop.xlane.xlu0 %134 }
 0x270   :  { %v138_v5 = vadd.f32 %v135_v3, %v116_v1 }
 0x272   :  { %141 = vst.msk [vmem:[#allocation3] sm:$0xff] %vm20_vm2, %v138_v5 }
 0x273   :  { %v137_v7 = vpop.xlane.xlu1 %136 }
 0x274   :  { %v139_v9 = vadd.f32 %v137_v7, %v117_v6 }
 0x276   :  { %142 = vst.msk [vmem:[#allocation3 + $0x8] sm:$0xff] %vm20_vm2, %v139_v9  ;;  %v295_v9 = vld [vmem:[#allocation4 + $0x5] sm:$0x1] }
 0x279   :  { %v282_v11 = vld [vmem:[#allocation3] sm:$0xff] }
 0x27a   :  { %627 = vlog2.f32 %v282_v11 }
 0x27d   :  { %v283_v12 = vld [vmem:[#allocation3 + $0x8] sm:$0xff] }
 0x27e   :  { %629 = vlog2.f32 %v283_v12 }
 0x287   :  { %v628_v13 = vpop.eup %627 }
 0x288   :  { %v285_v14 = vmul.f32 0.6931472, %v628_v13 }
 0x28a   :  { %v288_v16 = vadd.f32 %v285_v14, %v280_v15  ;;  %v298_v14 = vld [vmem:[#allocation4 + $0x8] sm:$0x1] }
 0x28b   :  { %v630_v19 = vpop.eup %629 }
 0x28c   :  { %v315_v17 = vrot.slane %v288_v16, %v696_v10  ;;  %v308_v18 = vcombine.high %v288_v16, %v288_v16  ;;  %v287_v24 = vmul.f32 0.6931472, %v630_v19 }
 0x28e   :  { %v331_v20 = vrot.slane %v315_v17, %v696_v10  ;;  %v323_v21 = vcombine.high %v315_v17, %v315_v17  ;;  %v322_v23 = vrot.slane %v308_v18, %v696_v10  ;;  %v289_v28 = vadd.f32 %v287_v24, %v281_v26  ;;  %v297_v18 = vld [vmem:[#allocation4 + $0x7] sm:$0x1]  ;;  %v299_v26 = vld [vmem:[#allocation4 + $0x9] sm:$0x1] }
 0x290   :  { %407 = vperm.xlu0 %615, %v331_v20   ;;  %v345_v22 = vrot.slane %v323_v21, %v696_v10  ;;  %v353_v25 = vcombine.high %v331_v20, %v331_v20  ;;  %v338_v27 = vrot.slane %v322_v23, %v696_v10  ;;  %v324_v30 = vcombine.high %v322_v23, %v322_v23 }
 0x291   :  { %v364_v32 = vrot.slane %v289_v28, %v696_v10  ;;  %v357_v35 = vcombine.high %v289_v28, %v289_v28 }
 0x292   :  { %415 = vperm.xlu1 %614, %v345_v22   ;;  %v355_v29 = vcombine.high %v345_v22, %v345_v22  ;;  %v354_v31 = vcombine.high %v338_v27, %v338_v27  ;;  %v352_v33 = vrot.slane %v324_v30, %v696_v10  ;;  %v300_v22 = vld [vmem:[#allocation4 + $0xa] sm:$0x1]  ;;  %v302_v30 = vld [vmem:[#allocation4 + $0xc] sm:$0x1] }
 0x293   :  { %v380_v34 = vrot.slane %v364_v32, %v696_v10  ;;  %v372_v37 = vcombine.high %v364_v32, %v364_v32  ;;  %v371_v39 = vrot.slane %v357_v35, %v696_v10 }
 0x294   :  { %423 = vperm.xlu0 %615, %v353_v25   ;;  %v356_v36 = vcombine.high %v352_v33, %v352_v33 }
 0x295   :  { %v402_v38 = vcombine.high %v380_v34, %v380_v34  ;;  %v394_v40 = vrot.slane %v372_v37, %v696_v10  ;;  %v387_v41 = vrot.slane %v371_v39, %v696_v10  ;;  %v373_v43 = vcombine.high %v371_v39, %v371_v39 }
 0x296   :  { %439 = vperm.xlu1 %614, %v338_v27  }
 0x297   :  { %v404_v42 = vcombine.high %v394_v40, %v394_v40  ;;  %v403_v44 = vcombine.high %v387_v41, %v387_v41  ;;  %v401_v45 = vrot.slane %v373_v43, %v696_v10 }
 0x298   :  { %431 = vperm.xlu0 %615, %v355_v29  }
 0x299   :  { %v405_v46 = vcombine.high %v401_v45, %v401_v45 }
 0x29a   :  { %455 = vperm.xlu1 %614, %v354_v31  }
 0x29c   :  { %447 = vperm.xlu0 %615, %v352_v33  }
 0x29e   :  { %471 = vperm.xlu1 %614, %v380_v34   ;;  %v301_v34 = vld [vmem:[#allocation4 + $0xb] sm:$0x1] }
 0x2a0   :  { %463 = vperm.xlu0 %615, %v356_v36  }
 0x2a2   :  { %487 = vperm.xlu1 %614, %v402_v38   ;;  %v304_v38 = vld [vmem:[#allocation4 + $0xe] sm:$0x1] }
 0x2a4   :  { %479 = vperm.xlu0 %615, %v394_v40  }
 0x2a6   :  { %503 = vperm.xlu1 %614, %v387_v41  }
 0x2a8   :  { %495 = vperm.xlu0 %615, %v404_v42   ;;  %v303_v42 = vld [vmem:[#allocation4 + $0xd] sm:$0x1] }
 0x2aa   :  { %519 = vperm.xlu1 %614, %v403_v44  }
 0x2ac   :  { %511 = vperm.xlu0 %615, %v401_v45  }
 0x2b0   :  { %527 = vperm.xlu0 %615, %v405_v46   ;;  %v305_v46 = vld [vmem:[#allocation4 + $0xf] sm:$0x1] }
 0x30b   :  { %v408_v48 = vpop.permute.xlu0 %407 }
 0x30c   :  { %v413_v49 = vrot.slane %v408_v48, %v745_v47 }
 0x30d   :  { %v416_v51 = vpop.permute.xlu1 %415 }
 0x30e   :  { %v534_v52 = vsub.f32 %v290_v50, %v413_v49  ;;  %v421_v53 = vrot.slane %v416_v51, %v745_v47 }
 0x30f   :  { %v424_v55 = vpop.permute.xlu0 %423 }
 0x310   :  { %550 = vst [vmem:[#allocation4] sm:$0x1] %v534_v52  ;;  %v535_v56 = vsub.f32 %v291_v54, %v421_v53  ;;  %v429_v10 = vrot.slane %v424_v55, %v745_v47 }
 0x311   :  { %v440_v58 = vpop.permute.xlu1 %439 }
 0x312   :  { %551 = vst [vmem:[#allocation4 + $0x1] sm:$0x1] %v535_v56  ;;  %v536_v59 = vsub.f32 %v292_v57, %v429_v10  ;;  %v445_v8 = vrot.slane %v440_v58, %v745_v47 }
 0x313   :  { %v432_v61 = vpop.permute.xlu0 %431 }
 0x314   :  { %552 = vst [vmem:[#allocation4 + $0x2] sm:$0x1] %v536_v59  ;;  %v538_v62 = vsub.f32 %v294_v60, %v445_v8  ;;  %v437_v63 = vrot.slane %v432_v61, %v745_v47 }
 0x315   :  { %v456_v1 = vpop.permute.xlu1 %455 }
 0x316   :  { %554 = vst [vmem:[#allocation4 + $0x4] sm:$0x1] %v538_v62  ;;  %v537_v2 = vsub.f32 %v293_v0, %v437_v63  ;;  %v461_v3 = vrot.slane %v456_v1, %v745_v47 }
 0x317   :  { %v448_v5 = vpop.permute.xlu0 %447 }
 0x318   :  { %553 = vst [vmem:[#allocation4 + $0x3] sm:$0x1] %v537_v2  ;;  %v540_v6 = vsub.f32 %v296_v4, %v461_v3  ;;  %v453_v7 = vrot.slane %v448_v5, %v745_v47 }
 0x319   :  { %v472_v11 = vpop.permute.xlu1 %471 }
 0x31a   :  { %556 = vst [vmem:[#allocation4 + $0x6] sm:$0x1] %v540_v6  ;;  %v539_v12 = vsub.f32 %v295_v9, %v453_v7  ;;  %v477_v13 = vrot.slane %v472_v11, %v745_v47 }
 0x31b   :  { %v464_v15 = vpop.permute.xlu0 %463 }
 0x31c   :  { %555 = vst [vmem:[#allocation4 + $0x5] sm:$0x1] %v539_v12  ;;  %v542_v16 = vsub.f32 %v298_v14, %v477_v13  ;;  %v469_v17 = vrot.slane %v464_v15, %v745_v47 }
 0x31d   :  { %v488_v19 = vpop.permute.xlu1 %487 }
 0x31e   :  { %558 = vst [vmem:[#allocation4 + $0x8] sm:$0x1] %v542_v16  ;;  %v541_v20 = vsub.f32 %v297_v18, %v469_v17  ;;  %v493_v21 = vrot.slane %v488_v19, %v745_v47 }
 0x31f   :  { %v480_v23 = vpop.permute.xlu0 %479 }
 0x320   :  { %557 = vst [vmem:[#allocation4 + $0x7] sm:$0x1] %v541_v20  ;;  %v544_v24 = vsub.f32 %v300_v22, %v493_v21  ;;  %v485_v25 = vrot.slane %v480_v23, %v745_v47 }
 0x321   :  { %v504_v27 = vpop.permute.xlu1 %503 }
 0x322   :  { %560 = vst [vmem:[#allocation4 + $0xa] sm:$0x1] %v544_v24  ;;  %v543_v28 = vsub.f32 %v299_v26, %v485_v25  ;;  %v509_v29 = vrot.slane %v504_v27, %v745_v47 }
 0x323   :  { %v496_v31 = vpop.permute.xlu0 %495 }
 0x324   :  { %559 = vst [vmem:[#allocation4 + $0x9] sm:$0x1] %v543_v28  ;;  %v546_v32 = vsub.f32 %v302_v30, %v509_v29  ;;  %v501_v33 = vrot.slane %v496_v31, %v745_v47 }
 0x325   :  { %v520_v35 = vpop.permute.xlu1 %519 }
 0x326   :  { %562 = vst [vmem:[#allocation4 + $0xc] sm:$0x1] %v546_v32  ;;  %v545_v36 = vsub.f32 %v301_v34, %v501_v33  ;;  %v525_v37 = vrot.slane %v520_v35, %v745_v47 }
 0x327   :  { %v512_v39 = vpop.permute.xlu0 %511 }
 0x328   :  { %561 = vst [vmem:[#allocation4 + $0xb] sm:$0x1] %v545_v36  ;;  %v548_v40 = vsub.f32 %v304_v38, %v525_v37  ;;  %v517_v41 = vrot.slane %v512_v39, %v745_v47 }
 0x32a   :  { %564 = vst [vmem:[#allocation4 + $0xe] sm:$0x1] %v548_v40  ;;  %v547_v43 = vsub.f32 %v303_v42, %v517_v41 }
 0x32b   :  { %v528_v44 = vpop.permute.xlu0 %527 }
 0x32c   :  { %563 = vst [vmem:[#allocation4 + $0xd] sm:$0x1] %v547_v43  ;;  %v533_v45 = vrot.slane %v528_v44, %v745_v47 }
 0x32e   :  { %v549_v48 = vsub.f32 %v305_v46, %v533_v45 }
 0x330   :  { %565 = vst [vmem:[#allocation4 + $0xf] sm:$0x1] %v549_v48 }
 0x331   :  { %642 = shalt.err (!%p639_p4)
}
 0x332   :  { %s659_s20 = smov 16   ;;  %s660_s21 = smov 1  }
 0x333   :  { %577 = dma.vmem_to_hbm [thread:$0]  %s572_s1, 256, %s769_s3, [#allocation5], %s659_s20, %s659_s20, %s660_s21  }
 0x334   :  { %651 = dma.done.wait [#allocation5], 256  }
 0x335   :  { %652 = vsyncadd [#allocation5], 4294967040 }
 0x336   :  { %581 = vsyncpa [#allocation5], 1 }

</bundles_post_ra>
